<compile_context>
chip_gen: v7x
topology: tpu7x:2x2x1
jax: 0.10.0
libtpu: 0.0.40
codegen_flags: <defaults>
</compile_context>

<pallas_src>
import jax
import jax.numpy as jnp
from jax import lax
from jax.experimental import pallas as pl
from jax.experimental.pallas import tpu as pltpu


def ann_kernel(x_ref, w1_ref, b1_ref, w2r_ref, b2_ref, o_ref):
    # x_ref  : (TB, D)      batch tile of X (streamed)
    # w1_ref : (D, H)       first-layer weight (stored transposed)
    # b1_ref : (1, H)  f32
    # w2r_ref: (1, H)  f32  second-layer weight as a row
    # b2_ref : (1, 1)  f32  SMEM scalar
    # o_ref  : (1, TB) f32  lane-dense output row for this tile
    h = jnp.dot(x_ref[...], w1_ref[...], preferred_element_type=jnp.float32)
    h = h + b1_ref[...]
    # LeakyReLU (PyTorch default negative_slope = 0.01)
    h = jnp.where(h > 0, h, 0.01 * h)
    # Second linear as (1,H) . (TB,H)^T -> (1,TB): result is already lane-dense,
    # and the MXU has huge slack in this HBM-bound kernel, so this costs nothing.
    y = lax.dot_general(
        w2r_ref[...], h,
        dimension_numbers=(((1,), (1,)), ((), ())),
        preferred_element_type=jnp.float32,
    )
    o_ref[...] = (y + b2_ref[0, 0]).astype(o_ref.dtype)


def _round_up(a, m):
    return ((a + m - 1) // m) * m


def ann_forward(x, w1, b1, w2, b2, *, block_b=8192, x_buffers=2):
    """Fused MLP forward.

    x  : (B, D)          (f32 or bf16; pass bf16-resident data to halve HBM traffic)
    w1 : (D, H)  (H=40)
    b1 : (1, H)
    w2 : (H, 1)
    b2 : (1, 1)
    returns (B,) f32  (== soc_hat.reshape(-1))
    """
    B, D = x.shape
    H = w1.shape[1]
    x_itemsize = jnp.dtype(x.dtype).itemsize

    # --- batch-tile selection (lane-padded VMEM math: D pads to 128 lanes) ----
    d_lanes = _round_up(D, 128)
    # Keep the multi-buffered X window under ~12 MiB -> safe under the 16 MiB
    # v5e scoped-VMEM default with headroom for resident weights + output.
    x_window_budget = 12 * 1024 * 1024
    max_rows = max(128, x_window_budget // (x_buffers * d_lanes * x_itemsize))
    tb = min(block_b, max_rows, _round_up(B, 128))
    tb = max(128, (tb // 128) * 128)
    # Give the "parallel" batch axis at least 2 tiles for megacore (v7x: 2 TCs).
    if B > 256 and pl.cdiv(B, tb) < 2:
        tb = max(128, _round_up(pl.cdiv(B, 2), 128))
    n_tiles = pl.cdiv(B, tb)
    b_out = n_tiles * tb

    # --- real VMEM footprint (lane/sublane padded) -> explicit limit if big ---
    h_lanes = _round_up(H, 128)
    x_buf_bytes = x_buffers * tb * d_lanes * x_itemsize
    out_buf_bytes = 2 * 8 * tb * 4                               # (1, tb) f32, 2 bufs
    w_buf_bytes = 2 * (_round_up(D, 8) * h_lanes * 4 + 2 * 8 * h_lanes * 4)
    vmem_needed = x_buf_bytes + out_buf_bytes + w_buf_bytes + (2 << 20)
    vmem_limit = None if vmem_needed <= (16 << 20) else min(vmem_needed, 64 << 20)

    # NOTE: do NOT cast x here — a wrapper-side astype is its own un-hidden HBM
    # pass.  Feed bf16-resident X/W1 from the producer if accuracy allows; f32
    # accumulation is preserved inside the kernel via preferred_element_type.
    b1r = jnp.reshape(b1, (1, H)).astype(jnp.float32)
    w2r = jnp.reshape(w2, (1, H)).astype(jnp.float32)            # (H,1) -> (1,H) row
    b2s = jnp.reshape(b2, (1, 1)).astype(jnp.float32)

    x_spec_kwargs = {}
    if x_buffers != 2:
        # Deeper buffering: only worth sweeping (2 vs 3) once tile size is fixed.
        x_spec_kwargs["pipeline_mode"] = pl.Buffered(x_buffers)

    cost = pl.CostEstimate(
        flops=int(2 * B * D * H + 4 * B * H),
        transcendentals=0,
        bytes_accessed=int(B * D * x_itemsize + B * 4 + (D * H + 2 * H + 1) * 4),
    )

    out = pl.pallas_call(
        ann_kernel,
        out_shape=jax.ShapeDtypeStruct((1, b_out), jnp.float32),
        grid_spec=pltpu.PrefetchScalarGridSpec(
            num_scalar_prefetch=0,
            grid=(n_tiles,),
            in_specs=[
                pl.BlockSpec((tb, D), lambda i: (i, 0), **x_spec_kwargs),  # X stream
                pl.BlockSpec((D, H), lambda i: (0, 0)),                    # W1 resident
                pl.BlockSpec((1, H), lambda i: (0, 0)),                    # b1 resident
                pl.BlockSpec((1, H), lambda i: (0, 0)),                    # w2 row
                pl.BlockSpec(memory_space=pltpu.MemorySpace.SMEM),         # b2 scalar
            ],
            out_specs=pl.BlockSpec((1, tb), lambda i: (0, i)),   # lane-dense row/tile
        ),
        compiler_params=pltpu.CompilerParams(
            dimension_semantics=("parallel",),   # batch tiles independent (2 TCs on v7x)
            vmem_limit_bytes=vmem_limit,
        ),
        cost_estimate=cost,
    )(x, w1, b1r, w2r, b2s)

    # Tail positions past B (from the over-covering grid / undefined tail rows
    # of the last X block) are discarded here; never reduce over them upstream.
    return out.reshape(-1)[:B]


def init_params(key, target_size, hidden=40):
    """Deterministic init mimicking nn.Linear default (uniform +/- 1/sqrt(fan_in))."""
    k1, k2, k3, k4 = jax.random.split(key, 4)
    bound1 = 1.0 / jnp.sqrt(jnp.float32(target_size))
    bound2 = 1.0 / jnp.sqrt(jnp.float32(hidden))
    w1 = jax.random.uniform(k1, (target_size, hidden), jnp.float32, -bound1, bound1)
    b1 = jax.random.uniform(k2, (1, hidden), jnp.float32, -bound1, bound1)
    w2 = jax.random.uniform(k3, (hidden, 1), jnp.float32, -bound2, bound2)
    b2 = jax.random.uniform(k4, (1, 1), jnp.float32, -bound2, bound2)
    return w1, b1, w2, b2


if __name__ == "__main__":
    key = jax.random.PRNGKey(0)
    kx, kp = jax.random.split(key)

    batch = 777          # deliberately NOT a multiple of the batch tile (ragged tail)
    target_size = 32     # number of selected spectral bands (module's target_size)

    x = jax.random.normal(kx, (batch, target_size), dtype=jnp.float32)
    w1, b1, w2, b2 = init_params(kp, target_size)

    # Default block_b=8192; with B=777 the wrapper picks tb=512 -> 2 tiles, so
    # the demo exercises the multi-tile pipelined path and the un-padded tail.
    soc_hat = ann_forward(x, w1, b1, w2, b2)
    soc_hat = jax.block_until_ready(soc_hat)

    # Pure-JAX reference (same math as the PyTorch module forward).
    h_ref = x @ w1 + b1
    h_ref = jnp.where(h_ref > 0, h_ref, 0.01 * h_ref)
    ref = (h_ref @ w2 + b2).reshape(-1)

    assert soc_hat.shape == (batch,)
    assert jnp.allclose(soc_hat, ref, atol=1e-4, rtol=1e-4), float(
        jnp.max(jnp.abs(soc_hat - ref)))
    print("KERNEL_OK")
</pallas_src>

<mosaic_0001>
module attributes {stable_mosaic.version = 11 : i64} {
  func.func @ann_kernel(%arg0: i32, %arg1: memref<512x32xf32, #tpu.memory_space<vmem>>, %arg2: memref<32x40xf32, #tpu.memory_space<vmem>>, %arg3: memref<1x40xf32, #tpu.memory_space<vmem>>, %arg4: memref<1x40xf32, #tpu.memory_space<vmem>>, %arg5: memref<1x1xf32, #tpu.memory_space<smem>>, %arg6: memref<1x512xf32, #tpu.memory_space<vmem>>) attributes {dimension_semantics = [#tpu.dimension_semantics<parallel>], iteration_bounds = array<i64: 2>, scalar_prefetch = 0 : i64, scratch_operands = 0 : i64, tpu.core_type = #tpu.core_type<tc>, window_params = [{transform_indices = @transform_0, window_bounds = array<i64: 512, 32>}, {pipeline_mode = #tpu.pipeline_mode<synchronous>, transform_indices = @transform_1, window_bounds = array<i64: 32, 40>}, {pipeline_mode = #tpu.pipeline_mode<synchronous>, transform_indices = @transform_2, window_bounds = array<i64: 1, 40>}, {pipeline_mode = #tpu.pipeline_mode<synchronous>, transform_indices = @transform_3, window_bounds = array<i64: 1, 40>}, {transform_indices = @transform_4, window_bounds = array<i64: 1, 1>}, {transform_indices = @transform_5, window_bounds = array<i64: 1, 512>}]} {
    %c0 = arith.constant 0 : index
    %c0_0 = arith.constant 0 : index
    %0 = vector.load %arg1[%c0, %c0_0] : memref<512x32xf32, #tpu.memory_space<vmem>>, vector<512x32xf32>
    %c0_1 = arith.constant 0 : index
    %c0_2 = arith.constant 0 : index
    %1 = vector.load %arg2[%c0_1, %c0_2] : memref<32x40xf32, #tpu.memory_space<vmem>>, vector<32x40xf32>
    %cst = arith.constant dense<0.000000e+00> : vector<512x40xf32>
    %2 = tpu.matmul %0, %1, %cst {dimension_numbers = #tpu.dot_dimension_numbers<[1], [0], [0], [1], [0, 0, 1, 1], [], []>} : vector<512x32xf32>, vector<32x40xf32>, vector<512x40xf32> -> vector<512x40xf32>
    %c0_3 = arith.constant 0 : index
    %c0_4 = arith.constant 0 : index
    %3 = vector.load %arg3[%c0_3, %c0_4] : memref<1x40xf32, #tpu.memory_space<vmem>>, vector<1x40xf32>
    %4 = vector.broadcast %3 : vector<1x40xf32> to vector<512x40xf32>
    %5 = arith.addf %2, %4 : vector<512x40xf32>
    %cst_5 = arith.constant 0.000000e+00 : f32
    %6 = vector.broadcast %cst_5 : f32 to vector<512x40xf32>
    %7 = arith.cmpf ogt, %5, %6 : vector<512x40xf32>
    %cst_6 = arith.constant 0.00999999977 : f32
    %8 = vector.broadcast %cst_6 : f32 to vector<512x40xf32>
    %9 = arith.mulf %8, %5 : vector<512x40xf32>
    %10 = arith.select %7, %5, %9 : vector<512x40xi1>, vector<512x40xf32>
    %c0_7 = arith.constant 0 : index
    %c0_8 = arith.constant 0 : index
    %11 = vector.load %arg4[%c0_7, %c0_8] : memref<1x40xf32, #tpu.memory_space<vmem>>, vector<1x40xf32>
    %cst_9 = arith.constant dense<0.000000e+00> : vector<1x512xf32>
    %12 = tpu.matmul %11, %10, %cst_9 {dimension_numbers = #tpu.dot_dimension_numbers<[1], [1], [0], [0], [0, 0, 1, 0], [], []>} : vector<1x40xf32>, vector<512x40xf32>, vector<1x512xf32> -> vector<1x512xf32>
    %c0_10 = arith.constant 0 : index
    %c0_11 = arith.constant 0 : index
    %13 = memref.load %arg5[%c0_10, %c0_11] : memref<1x1xf32, #tpu.memory_space<smem>>
    %14 = vector.broadcast %13 : f32 to vector<1x512xf32>
    %15 = arith.addf %12, %14 : vector<1x512xf32>
    %c0_12 = arith.constant 0 : index
    %c0_13 = arith.constant 0 : index
    %16 = vector.load %arg6[%c0_12, %c0_13] : memref<1x512xf32, #tpu.memory_space<vmem>>, vector<1x512xf32>
    tpu.vector_store %arg6[%c0_12, %c0_13], %15 {strides = array<i32>} : memref<1x512xf32, #tpu.memory_space<vmem>>, vector<1x512xf32>,
    return
  }
  func.func @transform_0(%arg0: i32) -> (i32, i32) {
    %c0_i32 = arith.constant 0 : i32
    %c0_i32_0 = arith.constant 0 : i32
    return %arg0, %c0_i32 : i32, i32
  }
  func.func @transform_1(%arg0: i32) -> (i32, i32) {
    %c0_i32 = arith.constant 0 : i32
    %c0_i32_0 = arith.constant 0 : i32
    %c0_i32_1 = arith.constant 0 : i32
    return %c0_i32, %c0_i32_0 : i32, i32
  }
  func.func @transform_2(%arg0: i32) -> (i32, i32) {
    %c0_i32 = arith.constant 0 : i32
    %c0_i32_0 = arith.constant 0 : i32
    %c0_i32_1 = arith.constant 0 : i32
    return %c0_i32, %c0_i32_0 : i32, i32
  }
  func.func @transform_3(%arg0: i32) -> (i32, i32) {
    %c0_i32 = arith.constant 0 : i32
    %c0_i32_0 = arith.constant 0 : i32
    %c0_i32_1 = arith.constant 0 : i32
    return %c0_i32, %c0_i32_0 : i32, i32
  }
  func.func @transform_4(%arg0: i32) -> (i32, i32) {
    %c0_i32 = arith.constant 0 : i32
    %c0_i32_0 = arith.constant 0 : i32
    %c0_i32_1 = arith.constant 0 : i32
    return %c0_i32, %c0_i32_0 : i32, i32
  }
  func.func @transform_5(%arg0: i32) -> (i32, i32) {
    %c0_i32 = arith.constant 0 : i32
    %c0_i32_0 = arith.constant 0 : i32
    return %c0_i32, %arg0 : i32, i32
  }
}

</mosaic_0001>

<bundles_post_ra>
// kernel: tpu_custom_call.1
= control target key start
LH: loop header
LB: loop body
LE: loop exit
PB: predicated region body
PF: predicated region fallthrough
CT: control target
= control target key end

     0   :  { %s2723_s0 = inlined_call_operand.vmem [shape: f32[777,32], index: 0, kind: input, shape index: {}]   ;;  %s2724_s1 = inlined_call_operand.vmem [shape: f32[32,40], index: 1, kind: input, shape index: {}]   ;;  %s2725_s2 = inlined_call_operand.vmem [shape: f32[1,40], index: 2, kind: input, shape index: {}]   ;;  %s2726_s3 = inlined_call_operand.vmem [shape: f32[1,40], index: 3, kind: input, shape index: {}]   ;;  %s2727_s4 = inlined_call_operand.<no memory space> [shape: f32[1,1], index: 4, kind: input, shape index: {}]   ;;  %s2728_s5 = inlined_call_operand.hbm [shape: f32[1,1024], index: 5, kind: output, shape index: {}]  }
   0x1   :  { %10 = sst [smem:[#allocation2]] %s2727_s4 }
   0x2   :  { %11 = vsyncpa [#allocation4], 0 }
   0x3   :  { %13 = vsyncpa [#allocation4 + $0x1], 0  ;;  %s2168_s20 = smov 0   ;;  %s2170_s21 = smov 0  }
   0x4   :  { %s2172_s22 = smov 0   ;;  %s2174_s23 = smov 0  }
   0x5 LB: > { %s1540_s4 = sadd.s32 4294967295, %s2131_s23   ;;  %s1541_s24 = sadd.s32 4294967294, %s2131_s23   ;;  %s2131_s23 = sphi %s2174_s23, %s2736_s23   ;;  %s2127_s22 = sphi %s2172_s22, %s2735_s22   ;;  %s2123_s21 = sphi %s2170_s21, %s2734_s21   ;;  %s2119_s20 = sphi %s2168_s20, %s2733_s20  }
   0x6   : > { %s2191_s25 = sadd.s32 1, %s2131_s23   ;;  %s136_s26 = sadd.s32 1, %s2127_s22 }
   0x7   : > { %s133_s27 = ssub.s32 %s2131_s23, %s2191_s25  ;;  %p146_p0 = scmp.ne.s32.totalorder %s2127_s22, %s2123_s21 }
   0x8   : > { %p134_p1 = scmp.eq.s32.totalorder %s133_s27, 0  ;;  %p147_p2 = scmp.eq.s32.totalorder %s1540_s4, 1 }
   0x9   : > { %p152_p3 = scmp.ne.s32.totalorder %s2123_s21, %s2119_s20  ;;  %p153_p4 = scmp.eq.s32.totalorder %s1541_s24, 1 }
   0xa   : > { %s2201_s28 = scalar_select %p134_p1, %s2127_s22, %s136_s26  }
   0xb   : > { %p2203_p5 = por %p147_p2, %p146_p0  ;;  %p2207_p6 = por %p153_p4, %p152_p3 }
   0xc   : > { %p1544_p7 = scmp.ge.s32.totalorder %s2131_s23, 1  ;;  %p200_p8 = scmp.lt.s32.totalorder %s2131_s23, 3 }
   0xe   : > { %p201_p9 = pnand %p1544_p7, %p200_p8 }
   0xf   : > { %v311_v0 = vld [vmem:[%s2724_s1] sm:$0xff] (!%p201_p9)  ;;  %v312_v1 = vld [vmem:[%s2724_s1 + $0x8] sm:$0xff] (!%p201_p9)  ;;  %v313_v2 = vld [vmem:[%s2724_s1 + $0x10] sm:$0xff] (!%p201_p9)  ;;  %s2222_s12 = sshll.u32 (!%p201_p9), %s1540_s4, 6  ;;  %vm322_vm0 = vcmask (!%p201_p9), 261120   ;;  %vm1095_vm1 = vcmask (!%p201_p9), 326656  }
  0x10   : > { %204 = sbr.rel (%p201_p9) target bundleno = 646 (0x286), region = 40  ;;  %v1925_v3 = vpack.c.bf16 (!%p201_p9), %v312_v1, %v311_v0  ;;  %v314_v4 = vld [vmem:[%s2724_s1 + $0x18] sm:$0xff] (!%p201_p9)  ;;  %p237_p10 = scmp.lt.s32.totalorder (!%p201_p9), %s2222_s12, 97 }
  0x11   : > { %v1929_v5 = vpack.c.bf16 (!%p201_p9), %v314_v4, %v313_v2  ;;  %s1093_s6 = sld [smem:[#allocation2]] (!%p201_p9)  ;;  %s229_s7 = sand.u32 (!%p201_p9), 1, %s2123_s21  }
  0x12   : > { %1926 = vmatprep.subr.bf16.mxu0 (!%p201_p9), %v1925_v3  ;;  %s1545_s8 = sshll.u32 (!%p201_p9), %s229_s7, 2  ;;  %s2681_s14 = scalar_lea.hbm (!%p201_p9), %s2728_s5, %s2222_s12 }
  0x13   : > { %1928 = vmatpush3.bf16.msra.mxu0 (!%p201_p9), %v1925_v3  ;;  %s231_s9 = scalar_lea.vmem (!%p201_p9), [#allocation3], %s1545_s8  ;;  %s2134_s17 = smov (!%p201_p9), [#allocation3]  }
  0x14   : > { %1930 = vmatprep.subr.bf16.mxu0 (!%p201_p9), %v1929_v5  ;;  %s1482_s10 = sshll.u32 (!%p201_p9), %s231_s9, 4  ;;  %s2073_s18 = sshll.u32 (!%p201_p9), %s2134_s17, 4  ;;  %s2683_s10 = int_to_ptr.vmem [resolvable:$true] %s1482_s10  ;;  %s2074_s18 = int_to_ptr.vmem [resolvable:$false] %s2073_s18 }
  0x15   : > { %p2076_p0 = scmp.lt.s32.totalorder (!%p201_p9), %s2683_s10, %s2074_s18 }
  0x17   : > { %s238_s15 = scalar_select %p237_p10, %s2222_s12, 97  ;;  %1932 = vmatpush3.bf16.msra.mxu0 %v1929_v5 }
  0x19   : > { %s1547_s16 = sshll.u32 %s238_s15, 3  ;;  %s1468_s15 = scalar_lea.sflag [#allocation4], %s229_s7 }
  0x1a   : > { %s2232_s19 = scalar_lea.vmem %s2723_s0, %s1547_s16  ;;  %s2069_s16 = scalar_lea.vmem %s2683_s10, 64 }
  0x1b   : > { %v247_v6 = vld [vmem:[%s2232_s19] sm:$0xff]  ;;  %v248_v7 = vld [vmem:[%s2232_s19 + $0x8] sm:$0xff]  ;;  %v249_v8 = vld [vmem:[%s2232_s19 + $0x10] sm:$0xff]  ;;  %p2070_p11 = scmp.ne.s32.totalorder %s2683_s10, %s2069_s16 }
  0x1c   : > { %1829 = vmatprep.mubr.msk.f32.mxu0 %vm322_vm0, %v247_v6  ;;  %v250_v9 = vld [vmem:[%s2232_s19 + $0x18] sm:$0xff]  ;;  %v251_v10 = vld [vmem:[%s2232_s19 + $0x20] sm:$0xff]  ;;  %v252_v11 = vld [vmem:[%s2232_s19 + $0x28] sm:$0xff] }
  0x1d   : > { %1830 = vmatmul.mubr.msk.f32.vlgmr.msra.gmra.mrb[0].mxu0 %vm322_vm0, %v248_v7  ;;  %v253_v12 = vld [vmem:[%s2232_s19 + $0x30] sm:$0xff]  ;;  %v254_v13 = vld [vmem:[%s2232_s19 + $0x38] sm:$0xff]  ;;  %v255_v14 = vld [vmem:[%s2232_s19 + $0x40] sm:$0xff]  ;;  %p2071_p12 = pnand %p2070_p11, %p2203_p5 }
  0x1e   : > { %1832 = vmatprep.mubr.msk.f32.mxu0 %vm322_vm0, %v249_v8  ;;  %v256_v15 = vld [vmem:[%s2232_s19 + $0x48] sm:$0xff]  ;;  %v257_v16 = vld [vmem:[%s2232_s19 + $0x50] sm:$0xff]  ;;  %v258_v17 = vld [vmem:[%s2232_s19 + $0x58] sm:$0xff] }
  0x1f   : > { %v259_v18 = vld [vmem:[%s2232_s19 + $0x60] sm:$0xff]  ;;  %v260_v19 = vld [vmem:[%s2232_s19 + $0x68] sm:$0xff]  ;;  %v261_v20 = vld [vmem:[%s2232_s19 + $0x70] sm:$0xff]  ;;  %p2072_p13 = pneg %p2071_p12 }
  0x20   : > { %v262_v21 = vld [vmem:[%s2232_s19 + $0x78] sm:$0xff]  ;;  %v263_v22 = vld [vmem:[%s2232_s19 + $0x80] sm:$0xff]  ;;  %v264_v23 = vld [vmem:[%s2232_s19 + $0x88] sm:$0xff] }
  0x21   : > { %1833 = vmatmul.mubr.msk.f32.gmra.mrb[2].mxu0 %vm322_vm0, %v250_v9  ;;  %v265_v24 = vld [vmem:[%s2232_s19 + $0x90] sm:$0xff]  ;;  %v266_v25 = vld [vmem:[%s2232_s19 + $0x98] sm:$0xff]  ;;  %v267_v26 = vld [vmem:[%s2232_s19 + $0xa0] sm:$0xff] }
  0x22   : > { %1835 = vmatprep.mubr.msk.f32.mxu0 %vm322_vm0, %v251_v10  ;;  %v268_v27 = vld [vmem:[%s2232_s19 + $0xa8] sm:$0xff]  ;;  %v269_v28 = vld [vmem:[%s2232_s19 + $0xb0] sm:$0xff]  ;;  %v270_v29 = vld [vmem:[%s2232_s19 + $0xb8] sm:$0xff] }
  0x23   : > { %v271_v30 = vld [vmem:[%s2232_s19 + $0xc0] sm:$0xff]  ;;  %v272_v31 = vld [vmem:[%s2232_s19 + $0xc8] sm:$0xff]  ;;  %v273_v32 = vld [vmem:[%s2232_s19 + $0xd0] sm:$0xff] }
  0x24   : > { %v274_v33 = vld [vmem:[%s2232_s19 + $0xd8] sm:$0xff]  ;;  %v275_v34 = vld [vmem:[%s2232_s19 + $0xe0] sm:$0xff]  ;;  %v276_v35 = vld [vmem:[%s2232_s19 + $0xe8] sm:$0xff] }
  0x25   : > { %1836 = vmatmul.mubr.msk.f32.gmra.mrb[4].mxu0 %vm322_vm0, %v252_v11  ;;  %v277_v36 = vld [vmem:[%s2232_s19 + $0xf0] sm:$0xff]  ;;  %v278_v37 = vld [vmem:[%s2232_s19 + $0xf8] sm:$0xff]  ;;  %v279_v38 = vld [vmem:[%s2232_s19 + $0x100] sm:$0xff] }
  0x26   : > { %1838 = vmatprep.mubr.msk.f32.mxu0 %vm322_vm0, %v253_v12  ;;  %v280_v39 = vld [vmem:[%s2232_s19 + $0x108] sm:$0xff]  ;;  %v281_v40 = vld [vmem:[%s2232_s19 + $0x110] sm:$0xff]  ;;  %v282_v41 = vld [vmem:[%s2232_s19 + $0x118] sm:$0xff] }
  0x27   : > { %v283_v42 = vld [vmem:[%s2232_s19 + $0x120] sm:$0xff]  ;;  %v284_v43 = vld [vmem:[%s2232_s19 + $0x128] sm:$0xff]  ;;  %v285_v44 = vld [vmem:[%s2232_s19 + $0x130] sm:$0xff] }
  0x28   : > { %v286_v45 = vld [vmem:[%s2232_s19 + $0x138] sm:$0xff]  ;;  %v287_v46 = vld [vmem:[%s2232_s19 + $0x140] sm:$0xff]  ;;  %v288_v47 = vld [vmem:[%s2232_s19 + $0x148] sm:$0xff] }
  0x29   : > { %1839 = vmatmul.mubr.msk.f32.gmra.mrb[6].mxu0 %vm322_vm0, %v254_v13  ;;  %v289_v48 = vld [vmem:[%s2232_s19 + $0x150] sm:$0xff]  ;;  %v290_v49 = vld [vmem:[%s2232_s19 + $0x158] sm:$0xff]  ;;  %v291_v50 = vld [vmem:[%s2232_s19 + $0x160] sm:$0xff] }
  0x2a   : > { %1841 = vmatprep.mubr.msk.f32.mxu0 %vm322_vm0, %v255_v14  ;;  %v292_v51 = vld [vmem:[%s2232_s19 + $0x168] sm:$0xff]  ;;  %v293_v52 = vld [vmem:[%s2232_s19 + $0x170] sm:$0xff]  ;;  %v294_v53 = vld [vmem:[%s2232_s19 + $0x178] sm:$0xff] }
  0x2b   : > { %v295_v54 = vld [vmem:[%s2232_s19 + $0x180] sm:$0xff]  ;;  %v296_v55 = vld [vmem:[%s2232_s19 + $0x188] sm:$0xff]  ;;  %v297_v56 = vld [vmem:[%s2232_s19 + $0x190] sm:$0xff] }
  0x2c   : > { %v298_v57 = vld [vmem:[%s2232_s19 + $0x198] sm:$0xff]  ;;  %v299_v58 = vld [vmem:[%s2232_s19 + $0x1a0] sm:$0xff]  ;;  %v300_v59 = vld [vmem:[%s2232_s19 + $0x1a8] sm:$0xff] }
  0x2d   : > { %1842 = vmatmul.mubr.msk.f32.gmra.mrb[8].mxu0 %vm322_vm0, %v256_v15  ;;  %v301_v60 = vld [vmem:[%s2232_s19 + $0x1b0] sm:$0xff]  ;;  %v302_v61 = vld [vmem:[%s2232_s19 + $0x1b8] sm:$0xff]  ;;  %v303_v62 = vld [vmem:[%s2232_s19 + $0x1c0] sm:$0xff] }
  0x2e   : > { %1844 = vmatprep.mubr.msk.f32.mxu0 %vm322_vm0, %v257_v16  ;;  %v304_v63 = vld [vmem:[%s2232_s19 + $0x1c8] sm:$0xff]  ;;  %v305_v0 = vld [vmem:[%s2232_s19 + $0x1d0] sm:$0xff]  ;;  %v306_v1 = vld [vmem:[%s2232_s19 + $0x1d8] sm:$0xff] }
  0x2f   : > { %v307_v2 = vld [vmem:[%s2232_s19 + $0x1e0] sm:$0xff]  ;;  %v308_v3 = vld [vmem:[%s2232_s19 + $0x1e8] sm:$0xff]  ;;  %v309_v4 = vld [vmem:[%s2232_s19 + $0x1f0] sm:$0xff] }
  0x30   : > { %v310_v5 = vld [vmem:[%s2232_s19 + $0x1f8] sm:$0xff]  ;;  %v2365_v6 = vld [vmem:[%s2726_s3] sm:$0x1]  ;;  %s2075_s19 = scalar_lea.vmem %s2074_s18, 128 }
  0x31   : > { %1845 = vmatmul.mubr.msk.f32.gmra.mrb[10].mxu0 %vm322_vm0, %v258_v17  ;;  %1785 = vmatprep.mubr.msk.f32.mxu1 %vm1095_vm1, %v2365_v6  ;;  %v2372_v7 = vld [vmem:[%s2725_s2] ss:$0 sm:$0xff]  ;;  %p2077_p1 = scmp.lt.s32.totalorder %s2075_s19, %s2069_s16 }
  0x32   : > { %1847 = vmatprep.mubr.msk.f32.mxu0 %vm322_vm0, %v259_v18 }
  0x33   : > { %p2078_p2 = por %p2077_p1, %p2076_p0 }
  0x35   : > { %1848 = vmatmul.mubr.msk.f32.gmra.mrb[12].mxu0 %vm322_vm0, %v260_v19  ;;  %p2079_p3 = pnand %p2078_p2, %p2072_p13 }
  0x36   : > { %1850 = vmatprep.mubr.msk.f32.mxu0 %vm322_vm0, %v261_v20 }
  0x39   : > { %1851 = vmatmul.mubr.msk.f32.gmra.mrb[14].mxu0 %vm322_vm0, %v262_v21 }
  0x3a   : > { %1853 = vmatprep.mubr.msk.f32.mxu0 %vm322_vm0, %v263_v22 }
  0x3d   : > { %1854 = vmatmul.mubr.msk.f32.gmra.mrb[16].mxu0 %vm322_vm0, %v264_v23 }
  0x3e   : > { %1856 = vmatprep.mubr.msk.f32.mxu0 %vm322_vm0, %v265_v24 }
  0x41   : > { %1857 = vmatmul.mubr.msk.f32.gmra.mrb[18].mxu0 %vm322_vm0, %v266_v25 }
  0x42   : > { %1859 = vmatprep.mubr.msk.f32.mxu0 %vm322_vm0, %v267_v26 }
  0x45   : > { %1860 = vmatmul.mubr.msk.f32.gmra.mrb[20].mxu0 %vm322_vm0, %v268_v27 }
  0x46   : > { %1862 = vmatprep.mubr.msk.f32.mxu0 %vm322_vm0, %v269_v28 }
  0x49   : > { %1863 = vmatmul.mubr.msk.f32.gmra.mrb[22].mxu0 %vm322_vm0, %v270_v29 }
  0x4a   : > { %1865 = vmatprep.mubr.msk.f32.mxu0 %vm322_vm0, %v271_v30 }
  0x4d   : > { %1866 = vmatmul.mubr.msk.f32.gmra.mrb[24].mxu0 %vm322_vm0, %v272_v31 }
  0x4e   : > { %1868 = vmatprep.mubr.msk.f32.mxu0 %vm322_vm0, %v273_v32 }
  0x51   : > { %1869 = vmatmul.mubr.msk.f32.gmra.mrb[26].mxu0 %vm322_vm0, %v274_v33 }
  0x52   : > { %1871 = vmatprep.mubr.msk.f32.mxu0 %vm322_vm0, %v275_v34 }
  0x55   : > { %1872 = vmatmul.mubr.msk.f32.gmra.mrb[28].mxu0 %vm322_vm0, %v276_v35 }
  0x56   : > { %1874 = vmatprep.mubr.msk.f32.mxu0 %vm322_vm0, %v277_v36 }
  0x59   : > { %1875 = vmatmul.mubr.msk.f32.gmra.mrb[30].mxu0 %vm322_vm0, %v278_v37 }
  0x5a   : > { %1877 = vmatprep.mubr.msk.f32.mxu0 %vm322_vm0, %v279_v38 }
  0x5d   : > { %1878 = vmatmul.mubr.msk.f32.gmra.mrb[32].mxu0 %vm322_vm0, %v280_v39 }
  0x5e   : > { %1880 = vmatprep.mubr.msk.f32.mxu0 %vm322_vm0, %v281_v40 }
  0x61   : > { %1881 = vmatmul.mubr.msk.f32.gmra.mrb[34].mxu0 %vm322_vm0, %v282_v41 }
  0x62   : > { %1883 = vmatprep.mubr.msk.f32.mxu0 %vm322_vm0, %v283_v42 }
  0x65   : > { %1884 = vmatmul.mubr.msk.f32.gmra.mrb[36].mxu0 %vm322_vm0, %v284_v43 }
  0x66   : > { %1886 = vmatprep.mubr.msk.f32.mxu0 %vm322_vm0, %v285_v44 }
  0x69   : > { %1887 = vmatmul.mubr.msk.f32.gmra.mrb[38].mxu0 %vm322_vm0, %v286_v45 }
  0x6a   : > { %1889 = vmatprep.mubr.msk.f32.mxu0 %vm322_vm0, %v287_v46 }
  0x6d   : > { %1890 = vmatmul.mubr.msk.f32.gmra.mrb[40].mxu0 %vm322_vm0, %v288_v47 }
  0x6e   : > { %1892 = vmatprep.mubr.msk.f32.mxu0 %vm322_vm0, %v289_v48 }
  0x71   : > { %1893 = vmatmul.mubr.msk.f32.gmra.mrb[42].mxu0 %vm322_vm0, %v290_v49 }
  0x72   : > { %1895 = vmatprep.mubr.msk.f32.mxu0 %vm322_vm0, %v291_v50 }
  0x75   : > { %1896 = vmatmul.mubr.msk.f32.gmra.mrb[44].mxu0 %vm322_vm0, %v292_v51 }
  0x76   : > { %1898 = vmatprep.mubr.msk.f32.mxu0 %vm322_vm0, %v293_v52 }
  0x79   : > { %1899 = vmatmul.mubr.msk.f32.gmra.mrb[46].mxu0 %vm322_vm0, %v294_v53 }
  0x7a   : > { %1901 = vmatprep.mubr.msk.f32.mxu0 %vm322_vm0, %v295_v54 }
  0x7d   : > { %1902 = vmatmul.mubr.msk.f32.gmra.mrb[48].mxu0 %vm322_vm0, %v296_v55 }
  0x7e   : > { %1904 = vmatprep.mubr.msk.f32.mxu0 %vm322_vm0, %v297_v56 }
  0x81   : > { %1905 = vmatmul.mubr.msk.f32.gmra.mrb[50].mxu0 %vm322_vm0, %v298_v57 }
  0x82   : > { %1907 = vmatprep.mubr.msk.f32.mxu0 %vm322_vm0, %v299_v58 }
  0x85   : > { %1908 = vmatmul.mubr.msk.f32.gmra.mrb[52].mxu0 %vm322_vm0, %v300_v59 }
  0x86   : > { %1910 = vmatprep.mubr.msk.f32.mxu0 %vm322_vm0, %v301_v60 }
  0x89   : > { %1911 = vmatmul.mubr.msk.f32.gmra.mrb[54].mxu0 %vm322_vm0, %v302_v61 }
  0x8a   : > { %1913 = vmatprep.mubr.msk.f32.mxu0 %vm322_vm0, %v303_v62 }
  0x8d   : > { %1914 = vmatmul.mubr.msk.f32.gmra.mrb[56].mxu0 %vm322_vm0, %v304_v63 }
  0x8e   : > { %1916 = vmatprep.mubr.msk.f32.mxu0 %vm322_vm0, %v305_v0 }
  0x91   : > { %1917 = vmatmul.mubr.msk.f32.gmra.mrb[58].mxu0 %vm322_vm0, %v306_v1 }
  0x92   : > { %1919 = vmatprep.mubr.msk.f32.mxu0 %vm322_vm0, %v307_v2 }
  0x95   : > { %1920 = vmatmul.mubr.msk.f32.gmra.mrb[60].mxu0 %vm322_vm0, %v308_v3 }
  0x96   : > { %1922 = vmatprep.mubr.msk.f32.mxu0 %vm322_vm0, %v309_v4 }
  0x99   : > { %1923 = vmatmul.mubr.msk.f32.gmra.mrb[62].mxu0 %vm322_vm0, %v310_v5 }
  0xf0   : > { %v1831_v8 = vpop.f32.mrb[0].mxu0 }
  0xf1   : > { %v587_v9 = vadd.f32 %v1831_v8, %v2372_v7  ;;  %v581_v10 = vpop.f32.mrb[1].mxu0 }
  0xf2   : > { %v582_v11 = vadd.f32 %v2372_v7, %v581_v10 }
  0xf3   : > { %vm901_vm2 = vcmp.gt.f32.partialorder %v587_v9, 0.0  ;;  %v965_v12 = vmul.f32 0.01, %v587_v9 }
  0xf4   : > { %vm900_vm3 = vcmp.gt.f32.partialorder %v582_v11, 0.0  ;;  %v964_v13 = vmul.f32 0.01, %v582_v11  ;;  %v1834_v14 = vpop.f32.mrb[2].mxu0 }
  0xf5   : > { %v597_v15 = vadd.f32 %v1834_v14, %v2372_v7  ;;  %v591_v16 = vpop.f32.mrb[3].mxu0  ;;  %v2377_v17 = vsel %vm901_vm2, %v587_v9, %v965_v12 }
  0xf6   : > { %v592_v18 = vadd.f32 %v2372_v7, %v591_v16  ;;  %v2380_v19 = vsel %vm900_vm3, %v582_v11, %v964_v13 }
  0xf7   : > { %vm903_vm4 = vcmp.gt.f32.partialorder %v597_v15, 0.0  ;;  %v967_v20 = vmul.f32 0.01, %v597_v15  ;;  %v1936_v21 = vpack.c.bf16 %v2377_v17, %v2380_v19 }
  0xf8   : > { %vm902_vm5 = vcmp.gt.f32.partialorder %v592_v18, 0.0  ;;  %v966_v22 = vmul.f32 0.01, %v592_v18  ;;  %v1837_v23 = vpop.f32.mrb[4].mxu0 }
  0xf9   : > { %v2384_v24 = vsel %vm903_vm4, %v597_v15, %v967_v20  ;;  %v607_v25 = vadd.f32 %v1837_v23, %v2372_v7  ;;  %v601_v26 = vpop.f32.mrb[5].mxu0 }
  0xfa   : > { %v2387_v27 = vsel %vm902_vm5, %v592_v18, %v966_v22  ;;  %v602_v28 = vadd.f32 %v2372_v7, %v601_v26  ;;  %vm2444_vm5 = vmpackc.low %vm1095_vm1, %vm1095_vm1 }
  0xfb   : > { %v1942_v29 = vpack.c.bf16 %v2384_v24, %v2387_v27  ;;  %vm905_vm6 = vcmp.gt.f32.partialorder %v607_v25, 0.0  ;;  %v969_v30 = vmul.f32 0.01, %v607_v25 }
  0xfc   : > { %vm904_vm7 = vcmp.gt.f32.partialorder %v602_v28, 0.0  ;;  %v968_v31 = vmul.f32 0.01, %v602_v28  ;;  %v1840_v32 = vpop.f32.mrb[6].mxu0 }
  0xfd   : > { %v2392_v33 = vsel %vm905_vm6, %v607_v25, %v969_v30  ;;  %v617_v34 = vadd.f32 %v1840_v32, %v2372_v7  ;;  %v611_v35 = vpop.f32.mrb[7].mxu0 }
  0xfe   : > { %v2395_v36 = vsel %vm904_vm7, %v602_v28, %v968_v31  ;;  %v612_v37 = vadd.f32 %v2372_v7, %v611_v35 }
  0xff   : > { %v1948_v38 = vpack.c.bf16 %v2392_v33, %v2395_v36  ;;  %vm907_vm8 = vcmp.gt.f32.partialorder %v617_v34, 0.0  ;;  %v971_v39 = vmul.f32 0.01, %v617_v34 }
 0x100   : > { %vm906_vm9 = vcmp.gt.f32.partialorder %v612_v37, 0.0  ;;  %v970_v40 = vmul.f32 0.01, %v612_v37  ;;  %v1843_v41 = vpop.f32.mrb[8].mxu0 }
 0x101   : > { %v2400_v42 = vsel %vm907_vm8, %v617_v34, %v971_v39  ;;  %v627_v43 = vadd.f32 %v1843_v41, %v2372_v7  ;;  %v621_v44 = vpop.f32.mrb[9].mxu0 }
 0x102   : > { %v2403_v45 = vsel %vm906_vm9, %v612_v37, %v970_v40  ;;  %v622_v46 = vadd.f32 %v2372_v7, %v621_v44 }
 0x103   : > { %v1954_v47 = vpack.c.bf16 %v2400_v42, %v2403_v45  ;;  %vm909_vm10 = vcmp.gt.f32.partialorder %v627_v43, 0.0  ;;  %v973_v48 = vmul.f32 0.01, %v627_v43 }
 0x104   : > { %vm908_vm11 = vcmp.gt.f32.partialorder %v622_v46, 0.0  ;;  %v972_v49 = vmul.f32 0.01, %v622_v46  ;;  %v1846_v50 = vpop.f32.mrb[10].mxu0 }
 0x105   : > { %v2408_v51 = vsel %vm909_vm10, %v627_v43, %v973_v48  ;;  %v637_v52 = vadd.f32 %v1846_v50, %v2372_v7  ;;  %v631_v53 = vpop.f32.mrb[11].mxu0 }
 0x106   : > { %v2411_v54 = vsel %vm908_vm11, %v622_v46, %v972_v49  ;;  %v632_v55 = vadd.f32 %v2372_v7, %v631_v53 }
 0x107   : > { %v1960_v56 = vpack.c.bf16 %v2408_v51, %v2411_v54  ;;  %vm911_vm12 = vcmp.gt.f32.partialorder %v637_v52, 0.0  ;;  %v975_v57 = vmul.f32 0.01, %v637_v52 }
 0x108   : > { %vm910_vm13 = vcmp.gt.f32.partialorder %v632_v55, 0.0  ;;  %v974_v58 = vmul.f32 0.01, %v632_v55  ;;  %v1849_v59 = vpop.f32.mrb[12].mxu0 }
 0x109   : > { %v2416_v60 = vsel %vm911_vm12, %v637_v52, %v975_v57  ;;  %v647_v61 = vadd.f32 %v1849_v59, %v2372_v7  ;;  %v641_v62 = vpop.f32.mrb[13].mxu0 }
 0x10a   : > { %v2419_v63 = vsel %vm910_vm13, %v632_v55, %v974_v58  ;;  %v642_v0 = vadd.f32 %v2372_v7, %v641_v62 }
 0x10b   : > { %v1966_v1 = vpack.c.bf16 %v2416_v60, %v2419_v63  ;;  %vm913_vm14 = vcmp.gt.f32.partialorder %v647_v61, 0.0  ;;  %v977_v2 = vmul.f32 0.01, %v647_v61 }
 0x10c   : > { %vm912_vm15 = vcmp.gt.f32.partialorder %v642_v0, 0.0  ;;  %v976_v3 = vmul.f32 0.01, %v642_v0  ;;  %v1852_v4 = vpop.f32.mrb[14].mxu0 }
 0x10d   : > { %v2424_v5 = vsel %vm913_vm14, %v647_v61, %v977_v2  ;;  %v657_v8 = vadd.f32 %v1852_v4, %v2372_v7  ;;  %v651_v9 = vpop.f32.mrb[15].mxu0 }
 0x10e   : > { %v2427_v10 = vsel %vm912_vm15, %v642_v0, %v976_v3  ;;  %v652_v11 = vadd.f32 %v2372_v7, %v651_v9 }
 0x10f   : > { %v1972_v12 = vpack.c.bf16 %v2424_v5, %v2427_v10  ;;  %vm915_vm0 = vcmp.gt.f32.partialorder %v657_v8, 0.0  ;;  %v979_v13 = vmul.f32 0.01, %v657_v8 }
 0x110   : > { %vm914_vm2 = vcmp.gt.f32.partialorder %v652_v11, 0.0  ;;  %v978_v14 = vmul.f32 0.01, %v652_v11  ;;  %v1855_v15 = vpop.f32.mrb[16].mxu0 }
 0x111   : > { %v2432_v16 = vsel %vm915_vm0, %v657_v8, %v979_v13  ;;  %v667_v18 = vadd.f32 %v1855_v15, %v2372_v7  ;;  %v661_v20 = vpop.f32.mrb[17].mxu0 }
 0x112   : > { %v2435_v22 = vsel %vm914_vm2, %v652_v11, %v978_v14  ;;  %v662_v23 = vadd.f32 %v2372_v7, %v661_v20 }
 0x113   : > { %v1978_v25 = vpack.c.bf16 %v2432_v16, %v2435_v22  ;;  %v981_v26 = vmul.f32 0.01, %v667_v18  ;;  %vm917_vm3 = vcmp.gt.f32.partialorder %v667_v18, 0.0 }
 0x114   : > { %v980_v28 = vmul.f32 0.01, %v662_v23  ;;  %v1858_v30 = vpop.f32.mrb[18].mxu0  ;;  %vm916_vm4 = vcmp.gt.f32.partialorder %v662_v23, 0.0 }
 0x115   : > { %v677_v31 = vadd.f32 %v1858_v30, %v2372_v7  ;;  %v671_v32 = vpop.f32.mrb[19].mxu0  ;;  %v1045_v34 = vsel %vm917_vm3, %v667_v18, %v981_v26 }
 0x116   : > { %v672_v35 = vadd.f32 %v2372_v7, %v671_v32  ;;  %v1044_v37 = vsel %vm916_vm4, %v662_v23, %v980_v28 }
 0x117   : > { %vm919_vm6 = vcmp.gt.f32.partialorder %v677_v31, 0.0  ;;  %v983_v40 = vmul.f32 0.01, %v677_v31  ;;  %v1933_v41 = vpack.c.bf16 %v1045_v34, %v1044_v37 }
 0x118   : > { %vm918_vm7 = vcmp.gt.f32.partialorder %v672_v35, 0.0  ;;  %v982_v43 = vmul.f32 0.01, %v672_v35  ;;  %v1861_v44 = vpop.f32.mrb[20].mxu0 }
 0x119   : > { %v1047_v46 = vsel %vm919_vm6, %v677_v31, %v983_v40  ;;  %v687_v48 = vadd.f32 %v1861_v44, %v2372_v7  ;;  %v681_v49 = vpop.f32.mrb[21].mxu0  ;;  %1935 = vmatprep.subr.msk.bf16.mxu1 %vm2444_vm5, %v1933_v41 }
 0x11a   : > { %v1046_v50 = vsel %vm918_vm7, %v672_v35, %v982_v43  ;;  %v682_v52 = vadd.f32 %v2372_v7, %v681_v49  ;;  %1938 = vmatpush3.bf16.xpose.msk.msra.mxu1 %vm2444_vm5, %v1936_v21 }
 0x11b   : > { %v1939_v53 = vpack.c.bf16 %v1047_v46, %v1046_v50  ;;  %vm921_vm8 = vcmp.gt.f32.partialorder %v687_v48, 0.0  ;;  %v985_v55 = vmul.f32 0.01, %v687_v48 }
 0x11c   : > { %vm920_vm9 = vcmp.gt.f32.partialorder %v682_v52, 0.0  ;;  %v984_v57 = vmul.f32 0.01, %v682_v52  ;;  %v1864_v58 = vpop.f32.mrb[22].mxu0 }
 0x11d   : > { %v1049_v59 = vsel %vm921_vm8, %v687_v48, %v985_v55  ;;  %v697_v61 = vadd.f32 %v1864_v58, %v2372_v7  ;;  %v691_v62 = vpop.f32.mrb[23].mxu0  ;;  %1941 = vmatprep.subr.msk.bf16.mxu1 %vm2444_vm5, %v1939_v53 }
 0x11e   : > { %v1048_v0 = vsel %vm920_vm9, %v682_v52, %v984_v57  ;;  %v692_v2 = vadd.f32 %v2372_v7, %v691_v62 }
 0x11f   : > { %v1945_v17 = vpack.c.bf16 %v1049_v59, %v1048_v0  ;;  %vm923_vm10 = vcmp.gt.f32.partialorder %v697_v61, 0.0  ;;  %v987_v19 = vmul.f32 0.01, %v697_v61 }
 0x120   : > { %vm922_vm11 = vcmp.gt.f32.partialorder %v692_v2, 0.0  ;;  %v986_v21 = vmul.f32 0.01, %v692_v2  ;;  %v1867_v3 = vpop.f32.mrb[24].mxu0 }
 0x121   : > { %v1051_v4 = vsel %vm923_vm10, %v697_v61, %v987_v19  ;;  %v707_v8 = vadd.f32 %v1867_v3, %v2372_v7  ;;  %v701_v9 = vpop.f32.mrb[25].mxu0 }
 0x122   : > { %v1050_v11 = vsel %vm922_vm11, %v692_v2, %v986_v21  ;;  %v702_v13 = vadd.f32 %v2372_v7, %v701_v9  ;;  %1944 = vmatpush3.bf16.xpose.msk.msra.mxu1 %vm2444_vm5, %v1942_v29 }
 0x123   : > { %v1951_v14 = vpack.c.bf16 %v1051_v4, %v1050_v11  ;;  %vm925_vm12 = vcmp.gt.f32.partialorder %v707_v8, 0.0  ;;  %v989_v15 = vmul.f32 0.01, %v707_v8  ;;  %1947 = vmatprep.subr.msk.bf16.mxu1 %vm2444_vm5, %v1945_v17 }
 0x124   : > { %vm924_vm13 = vcmp.gt.f32.partialorder %v702_v13, 0.0  ;;  %v988_v18 = vmul.f32 0.01, %v702_v13  ;;  %v1870_v20 = vpop.f32.mrb[26].mxu0 }
 0x125   : > { %v1053_v23 = vsel %vm925_vm12, %v707_v8, %v989_v15  ;;  %v717_v26 = vadd.f32 %v1870_v20, %v2372_v7  ;;  %v711_v28 = vpop.f32.mrb[27].mxu0 }
 0x126   : > { %v1052_v30 = vsel %vm924_vm13, %v702_v13, %v988_v18  ;;  %v712_v31 = vadd.f32 %v2372_v7, %v711_v28 }
 0x127   : > { %v1957_v24 = vpack.c.bf16 %v1053_v23, %v1052_v30  ;;  %vm927_vm14 = vcmp.gt.f32.partialorder %v717_v26, 0.0  ;;  %v991_v27 = vmul.f32 0.01, %v717_v26 }
 0x128   : > { %vm926_vm15 = vcmp.gt.f32.partialorder %v712_v31, 0.0  ;;  %v990_v29 = vmul.f32 0.01, %v712_v31  ;;  %v1873_v32 = vpop.f32.mrb[28].mxu0 }
 0x129   : > { %v1055_v34 = vsel %vm927_vm14, %v717_v26, %v991_v27  ;;  %v727_v35 = vadd.f32 %v1873_v32, %v2372_v7  ;;  %v721_v37 = vpop.f32.mrb[29].mxu0 }
 0x12a   : > { %v1054_v40 = vsel %vm926_vm15, %v712_v31, %v990_v29  ;;  %v722_v41 = vadd.f32 %v2372_v7, %v721_v37  ;;  %1950 = vmatpush3.bf16.xpose.msk.msra.mxu1 %vm2444_vm5, %v1948_v38 }
 0x12b   : > { %v1963_v43 = vpack.c.bf16 %v1055_v34, %v1054_v40  ;;  %vm929_vm0 = vcmp.gt.f32.partialorder %v727_v35, 0.0  ;;  %v993_v44 = vmul.f32 0.01, %v727_v35  ;;  %1953 = vmatprep.subr.msk.bf16.mxu1 %vm2444_vm5, %v1951_v14 }
 0x12c   : > { %vm928_vm2 = vcmp.gt.f32.partialorder %v722_v41, 0.0  ;;  %v992_v46 = vmul.f32 0.01, %v722_v41  ;;  %v1876_v48 = vpop.f32.mrb[30].mxu0 }
 0x12d   : > { %v2481_v49 = vsel %vm929_vm0, %v727_v35, %v993_v44  ;;  %v737_v50 = vadd.f32 %v1876_v48, %v2372_v7  ;;  %v731_v52 = vpop.f32.mrb[31].mxu0 }
 0x12e   : > { %v2484_v53 = vsel %vm928_vm2, %v722_v41, %v992_v46  ;;  %v732_v33 = vadd.f32 %v2372_v7, %v731_v52 }
 0x12f   : > { %v1969_v36 = vpack.c.bf16 %v2481_v49, %v2484_v53  ;;  %vm931_vm3 = vcmp.gt.f32.partialorder %v737_v50, 0.0  ;;  %v995_v38 = vmul.f32 0.01, %v737_v50 }
 0x130   : > { %vm930_vm4 = vcmp.gt.f32.partialorder %v732_v33, 0.0  ;;  %v994_v55 = vmul.f32 0.01, %v732_v33  ;;  %v1879_v57 = vpop.f32.mrb[32].mxu0 }
 0x131   : > { %v2489_v58 = vsel %vm931_vm3, %v737_v50, %v995_v38  ;;  %v747_v59 = vadd.f32 %v1879_v57, %v2372_v7  ;;  %v741_v61 = vpop.f32.mrb[33].mxu0 }
 0x132   : > { %v2492_v62 = vsel %vm930_vm4, %v732_v33, %v994_v55  ;;  %v742_v0 = vadd.f32 %v2372_v7, %v741_v61  ;;  %1956 = vmatpush3.bf16.xpose.msk.msra.mxu1 %vm2444_vm5, %v1954_v47 }
 0x133   : > { %v1975_v2 = vpack.c.bf16 %v2489_v58, %v2492_v62  ;;  %vm933_vm6 = vcmp.gt.f32.partialorder %v747_v59, 0.0  ;;  %v997_v17 = vmul.f32 0.01, %v747_v59  ;;  %1959 = vmatprep.subr.msk.bf16.mxu1 %vm2444_vm5, %v1957_v24 }
 0x134   : > { %vm932_vm7 = vcmp.gt.f32.partialorder %v742_v0, 0.0  ;;  %v996_v19 = vmul.f32 0.01, %v742_v0  ;;  %v1882_v21 = vpop.f32.mrb[34].mxu0 }
 0x135   : > { %v2504_v3 = vsel %vm933_vm6, %v747_v59, %v997_v17  ;;  %v757_v4 = vadd.f32 %v1882_v21, %v2372_v7  ;;  %v751_v8 = vpop.f32.mrb[35].mxu0 }
 0x136   : > { %v2507_v42 = vsel %vm932_vm7, %v742_v0, %v996_v19  ;;  %v752_v45 = vadd.f32 %v2372_v7, %v751_v8 }
 0x137   : > { %v1984_v47 = vpack.c.bf16 %v2504_v3, %v2507_v42  ;;  %vm935_vm8 = vcmp.gt.f32.partialorder %v757_v4, 0.0  ;;  %v999_v9 = vmul.f32 0.01, %v757_v4 }
 0x138   : > { %vm934_vm9 = vcmp.gt.f32.partialorder %v752_v45, 0.0  ;;  %v998_v11 = vmul.f32 0.01, %v752_v45  ;;  %v1885_v13 = vpop.f32.mrb[36].mxu0 }
 0x139   : > { %v2512_v14 = vsel %vm935_vm8, %v757_v4, %v999_v9  ;;  %v767_v15 = vadd.f32 %v1885_v13, %v2372_v7  ;;  %v761_v18 = vpop.f32.mrb[37].mxu0 }
 0x13a   : > { %v2515_v20 = vsel %vm934_vm9, %v752_v45, %v998_v11  ;;  %v762_v23 = vadd.f32 %v2372_v7, %v761_v18  ;;  %1962 = vmatpush3.bf16.xpose.msk.msra.mxu1 %vm2444_vm5, %v1960_v56 }
 0x13b   : > { %v1990_v26 = vpack.c.bf16 %v2512_v14, %v2515_v20  ;;  %vm937_vm10 = vcmp.gt.f32.partialorder %v767_v15, 0.0  ;;  %v1001_v28 = vmul.f32 0.01, %v767_v15  ;;  %1965 = vmatprep.subr.msk.bf16.mxu1 %vm2444_vm5, %v1963_v43 }
 0x13c   : > { %vm936_vm11 = vcmp.gt.f32.partialorder %v762_v23, 0.0  ;;  %v1000_v30 = vmul.f32 0.01, %v762_v23  ;;  %v1888_v31 = vpop.f32.mrb[38].mxu0 }
 0x13d   : > { %v2527_v24 = vsel %vm937_vm10, %v767_v15, %v1001_v28  ;;  %v777_v27 = vadd.f32 %v1888_v31, %v2372_v7  ;;  %v771_v29 = vpop.f32.mrb[39].mxu0 }
 0x13e   : > { %v2530_v51 = vsel %vm936_vm11, %v762_v23, %v1000_v30  ;;  %v772_v54 = vadd.f32 %v2372_v7, %v771_v29 }
 0x13f   : > { %v1996_v56 = vpack.c.bf16 %v2527_v24, %v2530_v51  ;;  %vm939_vm12 = vcmp.gt.f32.partialorder %v777_v27, 0.0  ;;  %v1003_v32 = vmul.f32 0.01, %v777_v27 }
 0x140   : > { %vm938_vm13 = vcmp.gt.f32.partialorder %v772_v54, 0.0  ;;  %v1002_v34 = vmul.f32 0.01, %v772_v54  ;;  %v1891_v35 = vpop.f32.mrb[40].mxu0 }
 0x141   : > { %v2535_v37 = vsel %vm939_vm12, %v777_v27, %v1003_v32  ;;  %v787_v40 = vadd.f32 %v1891_v35, %v2372_v7  ;;  %v781_v41 = vpop.f32.mrb[41].mxu0 }
 0x142   : > { %v2538_v43 = vsel %vm938_vm13, %v772_v54, %v1002_v34  ;;  %v782_v44 = vadd.f32 %v2372_v7, %v781_v41  ;;  %1968 = vmatpush3.bf16.xpose.msk.msra.mxu1 %vm2444_vm5, %v1966_v1 }
 0x143   : > { %v2002_v46 = vpack.c.bf16 %v2535_v37, %v2538_v43  ;;  %vm941_vm14 = vcmp.gt.f32.partialorder %v787_v40, 0.0  ;;  %v1005_v48 = vmul.f32 0.01, %v787_v40  ;;  %1971 = vmatprep.subr.msk.bf16.mxu1 %vm2444_vm5, %v1969_v36 }
 0x144   : > { %vm940_vm15 = vcmp.gt.f32.partialorder %v782_v44, 0.0  ;;  %v1004_v50 = vmul.f32 0.01, %v782_v44  ;;  %v1894_v52 = vpop.f32.mrb[42].mxu0 }
 0x145   : > { %v2553_v33 = vsel %vm941_vm14, %v787_v40, %v1005_v48  ;;  %v797_v60 = vadd.f32 %v1894_v52, %v2372_v7  ;;  %v791_v63 = vpop.f32.mrb[43].mxu0 }
 0x146   : > { %v2556_v1 = vsel %vm940_vm15, %v782_v44, %v1004_v50  ;;  %v792_v38 = vadd.f32 %v2372_v7, %v791_v63 }
 0x147   : > { %v2008_v55 = vpack.c.bf16 %v2553_v33, %v2556_v1  ;;  %vm943_vm0 = vcmp.gt.f32.partialorder %v797_v60, 0.0  ;;  %v1007_v49 = vmul.f32 0.01, %v797_v60 }
 0x148   : > { %vm942_vm2 = vcmp.gt.f32.partialorder %v792_v38, 0.0  ;;  %v1006_v53 = vmul.f32 0.01, %v792_v38  ;;  %v1897_v36 = vpop.f32.mrb[44].mxu0 }
 0x149   : > { %v2561_v57 = vsel %vm943_vm0, %v797_v60, %v1007_v49  ;;  %v807_v59 = vadd.f32 %v1897_v36, %v2372_v7  ;;  %v801_v61 = vpop.f32.mrb[45].mxu0 }
 0x14a   : > { %v2564_v0 = vsel %vm942_vm2, %v792_v38, %v1006_v53  ;;  %v802_v17 = vadd.f32 %v2372_v7, %v801_v61  ;;  %1974 = vmatpush3.bf16.xpose.msk.msra.mxu1 %vm2444_vm5, %v1972_v12 }
 0x14b   : > { %v2014_v19 = vpack.c.bf16 %v2561_v57, %v2564_v0  ;;  %vm945_vm3 = vcmp.gt.f32.partialorder %v807_v59, 0.0  ;;  %v1009_v21 = vmul.f32 0.01, %v807_v59  ;;  %1977 = vmatprep.subr.msk.bf16.mxu1 %vm2444_vm5, %v1975_v2  ;;  %v1442_v0 = vlaneseq }
 0x14c   : > { %vm944_vm4 = vcmp.gt.f32.partialorder %v802_v17, 0.0  ;;  %v1008_v4 = vmul.f32 0.01, %v802_v17  ;;  %v1900_v8 = vpop.f32.mrb[46].mxu0 }
 0x14d   : > { %v2579_v45 = vsel %vm945_vm3, %v807_v59, %v1009_v21  ;;  %v817_v5 = vadd.f32 %v1900_v8, %v2372_v7  ;;  %v811_v10 = vpop.f32.mrb[47].mxu0 }
 0x14e   : > { %v2582_v12 = vsel %vm944_vm4, %v802_v17, %v1008_v4  ;;  %v812_v9 = vadd.f32 %v2372_v7, %v811_v10 }
 0x14f   : > { %v2020_v11 = vpack.c.bf16 %v2579_v45, %v2582_v12  ;;  %vm947_vm6 = vcmp.gt.f32.partialorder %v817_v5, 0.0  ;;  %v1011_v58 = vmul.f32 0.01, %v817_v5  ;;  %v1443_v45 = vshrl.u32 %v1442_v0, 7 }
 0x150   : > { %vm946_vm7 = vcmp.gt.f32.partialorder %v812_v9, 0.0  ;;  %v1010_v62 = vmul.f32 0.01, %v812_v9  ;;  %v1903_v2 = vpop.f32.mrb[48].mxu0 }
 0x151   : > { %v2587_v13 = vsel %vm947_vm6, %v817_v5, %v1011_v58  ;;  %v827_v15 = vadd.f32 %v1903_v2, %v2372_v7  ;;  %v821_v18 = vpop.f32.mrb[49].mxu0 }
 0x152   : > { %v2590_v23 = vsel %vm946_vm7, %v812_v9, %v1010_v62  ;;  %v822_v28 = vadd.f32 %v2372_v7, %v821_v18  ;;  %1980 = vmatpush3.bf16.xpose.msk.msra.mxu1 %vm2444_vm5, %v1978_v25 }
 0x153   : > { %v2026_v30 = vpack.c.bf16 %v2587_v13, %v2590_v23  ;;  %vm949_vm8 = vcmp.gt.f32.partialorder %v827_v15, 0.0  ;;  %v1013_v31 = vmul.f32 0.01, %v827_v15 }
 0x154   : > { %vm948_vm9 = vcmp.gt.f32.partialorder %v822_v28, 0.0  ;;  %v1012_v27 = vmul.f32 0.01, %v822_v28  ;;  %v1906_v29 = vpop.f32.mrb[50].mxu0 }
 0x155   : > { %v1077_v54 = vsel %vm949_vm8, %v827_v15, %v1013_v31  ;;  %v837_v32 = vadd.f32 %v1906_v29, %v2372_v7  ;;  %v831_v34 = vpop.f32.mrb[51].mxu0 }
 0x156   : > { %v1076_v35 = vsel %vm948_vm9, %v822_v28, %v1012_v27  ;;  %v832_v40 = vadd.f32 %v2372_v7, %v831_v34 }
 0x157   : > { %v1981_v41 = vpack.c.bf16 %v1077_v54, %v1076_v35  ;;  %vm951_vm10 = vcmp.gt.f32.partialorder %v837_v32, 0.0  ;;  %v1015_v16 = vmul.f32 0.01, %v837_v32 }
 0x158   : > { %vm950_vm11 = vcmp.gt.f32.partialorder %v832_v40, 0.0  ;;  %v1014_v22 = vmul.f32 0.01, %v832_v40  ;;  %v1909_v25 = vpop.f32.mrb[52].mxu0 }
 0x159   : > { %v1079_v44 = vsel %vm951_vm10, %v837_v32, %v1015_v16  ;;  %1786 = vmatmul.mubr.msk.f32.vlgmr.msra.gmra.mrb[0].mxu1 %vm1095_vm1, %v2365_v6  ;;  %1983 = vmatprep.subr.msk.bf16.mxu1 %vm2444_vm5, %v1981_v41  ;;  %v847_v48 = vadd.f32 %v1909_v25, %v2372_v7  ;;  %v841_v50 = vpop.f32.mrb[53].mxu0 }
 0x15a   : > { %v1078_v52 = vsel %vm950_vm11, %v832_v40, %v1014_v22  ;;  %1986 = vmatpush3.bf16.xpose.msk.msra.mxu1 %vm2444_vm5, %v1984_v47  ;;  %v842_v60 = vadd.f32 %v2372_v7, %v841_v50  ;;  %1819 = vmatprep.mubr.msk.f32.mxu1 %vm1095_vm1, %v2365_v6 }
 0x15b   : > { %v1987_v63 = vpack.c.bf16 %v1079_v44, %v1078_v52  ;;  %vm953_vm12 = vcmp.gt.f32.partialorder %v847_v48, 0.0  ;;  %v1017_v38 = vmul.f32 0.01, %v847_v48 }
 0x15c   : > { %vm952_vm13 = vcmp.gt.f32.partialorder %v842_v60, 0.0  ;;  %v1016_v49 = vmul.f32 0.01, %v842_v60  ;;  %v1912_v53 = vpop.f32.mrb[54].mxu0 }
 0x15d   : > { %v1081_v36 = vsel %vm953_vm12, %v847_v48, %v1017_v38  ;;  %1989 = vmatprep.subr.msk.bf16.mxu1 %vm2444_vm5, %v1987_v63  ;;  %v857_v3 = vadd.f32 %v1912_v53, %v2372_v7  ;;  %v851_v42 = vpop.f32.mrb[55].mxu0 }
 0x15e   : > { %v1080_v59 = vsel %vm952_vm13, %v842_v60, %v1016_v49  ;;  %v852_v47 = vadd.f32 %v2372_v7, %v851_v42 }
 0x15f   : > { %v1993_v61 = vpack.c.bf16 %v1081_v36, %v1080_v59  ;;  %vm955_vm14 = vcmp.gt.f32.partialorder %v857_v3, 0.0  ;;  %v1019_v17 = vmul.f32 0.01, %v857_v3 }
 0x160   : > { %vm954_vm15 = vcmp.gt.f32.partialorder %v852_v47, 0.0  ;;  %v1018_v21 = vmul.f32 0.01, %v852_v47  ;;  %v1915_v4 = vpop.f32.mrb[56].mxu0 }
 0x161   : > { %v1083_v8 = vsel %vm955_vm14, %v857_v3, %v1019_v17  ;;  %v867_v5 = vadd.f32 %v1915_v4, %v2372_v7  ;;  %v861_v10 = vpop.f32.mrb[57].mxu0 }
 0x162   : > { %1992 = vmatpush3.bf16.xpose.msk.msra.mxu1 %vm2444_vm5, %v1990_v26  ;;  %v1082_v9 = vsel %vm954_vm15, %v852_v47, %v1018_v21  ;;  %v862_v58 = vadd.f32 %v2372_v7, %v861_v10 }
 0x163   : > { %v1999_v62 = vpack.c.bf16 %v1083_v8, %v1082_v9  ;;  %1995 = vmatprep.subr.msk.bf16.mxu1 %vm2444_vm5, %v1993_v61  ;;  %vm957_vm0 = vcmp.gt.f32.partialorder %v867_v5, 0.0  ;;  %v1021_v2 = vmul.f32 0.01, %v867_v5 }
 0x164   : > { %vm956_vm2 = vcmp.gt.f32.partialorder %v862_v58, 0.0  ;;  %v1020_v15 = vmul.f32 0.01, %v862_v58  ;;  %v1918_v18 = vpop.f32.mrb[58].mxu0 }
 0x165   : > { %v1085_v28 = vsel %vm957_vm0, %v867_v5, %v1021_v2  ;;  %v877_v31 = vadd.f32 %v1918_v18, %v2372_v7  ;;  %v871_v27 = vpop.f32.mrb[59].mxu0 }
 0x166   : > { %v1084_v14 = vsel %vm956_vm2, %v862_v58, %v1020_v15  ;;  %v872_v20 = vadd.f32 %v2372_v7, %v871_v27 }
 0x167   : > { %v2005_v26 = vpack.c.bf16 %v1085_v28, %v1084_v14  ;;  %vm959_vm3 = vcmp.gt.f32.partialorder %v877_v31, 0.0  ;;  %v1023_v29 = vmul.f32 0.01, %v877_v31 }
 0x168   : > { %vm958_vm4 = vcmp.gt.f32.partialorder %v872_v20, 0.0  ;;  %v1022_v54 = vmul.f32 0.01, %v872_v20  ;;  %v1921_v32 = vpop.f32.mrb[60].mxu0 }
 0x169   : > { %v1087_v34 = vsel %vm959_vm3, %v877_v31, %v1023_v29  ;;  %v887_v35 = vadd.f32 %v1921_v32, %v2372_v7  ;;  %v881_v40 = vpop.f32.mrb[61].mxu0 }
 0x16a   : > { %1998 = vmatpush3.bf16.xpose.msk.msra.mxu1 %vm2444_vm5, %v1996_v56  ;;  %v1086_v41 = vsel %vm958_vm4, %v872_v20, %v1022_v54  ;;  %v882_v16 = vadd.f32 %v2372_v7, %v881_v40 }
 0x16b   : > { %2001 = vmatprep.subr.msk.bf16.mxu1 %vm2444_vm5, %v1999_v62  ;;  %v2011_v22 = vpack.c.bf16 %v1087_v34, %v1086_v41  ;;  %vm961_vm6 = vcmp.gt.f32.partialorder %v887_v35, 0.0  ;;  %v1025_v25 = vmul.f32 0.01, %v887_v35 }
 0x16c   : > { %vm960_vm7 = vcmp.gt.f32.partialorder %v882_v16, 0.0  ;;  %v1024_v44 = vmul.f32 0.01, %v882_v16  ;;  %v1924_v48 = vpop.f32.mrb[62].mxu0 }
 0x16d   : > { %v1089_v50 = vsel %vm961_vm6, %v887_v35, %v1025_v25  ;;  %v897_v52 = vadd.f32 %v1924_v48, %v2372_v7  ;;  %v891_v60 = vpop.f32.mrb[63].mxu0 }
 0x16e   : > { %v1088_v24 = vsel %vm960_vm7, %v882_v16, %v1024_v44  ;;  %v892_v51 = vadd.f32 %v2372_v7, %v891_v60  ;;  %v1094_v7 = vstv %s1093_s6 }
 0x16f   : > { %v2017_v56 = vpack.c.bf16 %v1089_v50, %v1088_v24  ;;  %vm963_vm8 = vcmp.gt.f32.partialorder %v897_v52, 0.0  ;;  %v1027_v63 = vmul.f32 0.01, %v897_v52 }
 0x170   : > { %vm962_vm9 = vcmp.gt.f32.partialorder %v892_v51, 0.0  ;;  %v1026_v38 = vmul.f32 0.01, %v892_v51 }
 0x171   : > { %v1091_v49 = vsel %vm963_vm8, %v897_v52, %v1027_v63 }
 0x172   : > { %2004 = vmatpush3.bf16.xpose.msk.msra.mxu1 %vm2444_vm5, %v2002_v46  ;;  %v1090_v53 = vsel %vm962_vm9, %v892_v51, %v1026_v38 }
 0x173   : > { %2007 = vmatprep.subr.msk.bf16.mxu1 %vm2444_vm5, %v2005_v26  ;;  %v2023_v36 = vpack.c.bf16 %v1091_v49, %v1090_v53 }
 0x17a   : > { %2010 = vmatpush3.bf16.xpose.msk.msra.mxu1 %vm2444_vm5, %v2008_v55  ;;  %v2133_v55 = vmov 1966171168  }
 0x17b   : > { %2013 = vmatprep.subr.msk.bf16.mxu1 %vm2444_vm5, %v2011_v22  ;;  %v1440_v57 = vunpack.c.l.s4 %v2133_v55 }
 0x182   : > { %2016 = vmatpush3.bf16.xpose.msk.msra.mxu1 %vm2444_vm5, %v2014_v19  ;;  %v1441_v19 = vunpack.c.0.s8 %v1440_v57 }
 0x183   : > { %2019 = vmatprep.subr.msk.bf16.mxu1 %vm2444_vm5, %v2017_v56 }
 0x184   : > { %v1444_v13 = vsub.s32 %v1441_v19, %v1443_v45 }
 0x18a   : > { %2022 = vmatpush3.bf16.xpose.msk.msra.mxu1 %vm2444_vm5, %v2020_v11 }
 0x18b   : > { %2025 = vmatprep.subr.msk.bf16.mxu1 %vm2444_vm5, %v2023_v36 }
 0x192   : > { %2028 = vmatpush3.bf16.xpose.msk.msra.mxu1 %vm2444_vm5, %v2026_v30 }
 0x199   : > { %1820 = vmatmul.mubr.msk.f32.vlgmr.msra.gmra.mrb[2].mxu1 %vm1095_vm1, %v2365_v6  ;;  %vm1464_vm1 = vcmp.lt.s32.totalorder %v1442_v0, 512 }
 0x22c   : > { %v1357_v37 = vpop.f32.mrb[0].mxu1 }
 0x22d   : > { %v1358_v43 = vadd.f32 %v1357_v37, %v1094_v7  ;;  %v1359_v46 = vpop.f32.mrb[1].mxu1 }
 0x22e   : > { %v1360_v33 = vadd.f32 %v1359_v46, %v1094_v7 }
 0x230   : > { %v1437_v1 = vcombine.low %v1358_v43, %v1360_v33 }
 0x232   : > { %v1445_v30 = vrot.slane %v1437_v1, %v1444_v13 }
 0x26c   : > { %v1428_v12 = vpop.f32.mrb[2].mxu1 }
 0x26d   : > { %v1429_v39 = vadd.f32 %v1428_v12, %v1094_v7  ;;  %v1430_v11 = vpop.f32.mrb[3].mxu1 }
 0x26e   : > { %v1431_v6 = vadd.f32 %v1430_v11, %v1094_v7 }
 0x270   : > { %v1438_v23 = vcombine.low %v1429_v39, %v1431_v6 }
 0x272   : > { %v1452_v3 = vrot.slane %v1438_v23, %v1444_v13 }
 0x274   : > { %v1453_v42 = vcombine.low %v1445_v30, %v1452_v3 }
 0x276   : > { %v1460_v59 = vrot.slane %v1453_v42, %v1444_v13 }
 0x278   : > { %1466 = vst.msk [vmem:[%s231_s9] sm:$0xf] %vm1464_vm1, %v1460_v59 }
 0x279   : > { %2082 = shalt.err (!%p2079_p3)
}
 0x27a   : > { %s2083_s12 = scalar_lea.hbm %s2681_s14, 64  ;;  %s2087_s26 = scalar_lea.hbm %s2728_s5, 128 }
 0x27b   : > { %p2084_p4 = scmp.ne.s32.totalorder %s2681_s14, %s2083_s12  ;;  %p2088_p9 = scmp.lt.u32.totalorder %s2681_s14, %s2728_s5 }
 0x27c   : > { %p2089_p10 = scmp.lt.u32.totalorder %s2087_s26, %s2083_s12  ;;  %p2091_p12 = scmp.lt.u32.totalorder %s2083_s12, %s2681_s14 }
 0x27d   : > { %p2085_p7 = pnand %p2084_p4, %p2203_p5 }
 0x27e   : > { %p2090_p11 = por %p2089_p10, %p2088_p9 }
 0x27f   : > { %p2086_p8 = pneg %p2085_p7 }
 0x280   : > { %p2092_p13 = por %p2091_p12, %p2090_p11 }
 0x282   : > { %p2093_p0 = pnand %p2092_p13, %p2086_p8 }
 0x284   : > { %2096 = shalt.err (!%p2093_p0)
}
 0x285   : > { %2029 = dma.vmem_to_hbm [thread:$0]  (%p2203_p5), %s2683_s10, 64, %s2681_s14, %s1468_s15  }
 0x286 PF: > { %p2035_p1 = scmp.ge.s32.totalorder %s2131_s23, 2  ;;  %s1494_s7 = sand.u32 1, %s2119_s20  }
 0x287   : > { %s1495_s8 = scalar_lea.sflag [#allocation4], %s1494_s7 }
 0x288   : > { %p2032_p2 = pnand %p2035_p1, %p2207_p6 }
 0x28a   : > { %2114 = dma.done.wait (!%p2032_p2), %s1495_s8, 64  }
 0x28b   : > { %2116 = vsyncadd (!%p2032_p2), %s1495_s8, 4294967232  ;;  %p16_p3 = scmp.ge.s32.totalorder %s2191_s25, 4   ;;  %s2733_s20 = smov %s2123_s21 }
 0x28c   : > { %s2734_s21 = smov %s2127_s22  ;;  %s2735_s22 = smov %s2201_s28 }
 0x28d   : > { %s2736_s23 = smov %s2191_s25  ;;  %18 = sbr.rel (!%p16_p3) target bundleno = 5 (0x5), region = 75 }
 0x294   :  { %1500 = vsyncpa [#allocation4], 1 }
 0x295   :  { %1502 = vsyncpa [#allocation4 + $0x1], 1 }

</bundles_post_ra>
